<compile_context>
chip_gen: v7x
topology: tpu7x:2x2x1
jax: 0.10.0
libtpu: 0.0.40
codegen_flags: <defaults>
</compile_context>

<pallas_src>
import math

import jax
import jax.numpy as jnp
from jax.experimental import pallas as pl
from jax.experimental.pallas import tpu as pltpu


def _round_up(x: int, m: int) -> int:
    return ((x + m - 1) // m) * m


def _interactiveness_kernel(q_ref, w1_ref, b1_ref, w2t_ref, b2_ref, o_ref):
    # q_ref:   (TM, dim)     native dtype (f32 or bf16), streamed per grid step
    # w1_ref:  (dim, hidden) resident across steps
    # b1_ref:  (1, hidden)   f32
    # w2t_ref: (1, hidden)   f32, second Linear's weight pre-transposed
    # b2_ref:  (1, 1)        f32 scalar in SMEM
    # o_ref:   (TM, 1)       f32 logits
    x = q_ref[...]  # keep native dtype; MXU consumes bf16/f32 with f32 accumulation

    # Linear 1 (MXU) + bias + ReLU (VPU).
    h = jnp.dot(x, w1_ref[...], preferred_element_type=jnp.float32)
    h = jnp.maximum(h + b1_ref[...], 0.0)

    # Linear 2: output width 1 -> VPU multiply + lane reduce (XLU) instead of an
    # N=1 MXU matmul that would waste the systolic array and its result FIFO.
    out = jnp.sum(h * w2t_ref[...], axis=-1, keepdims=True) + b2_ref[0, 0]

    o_ref[...] = out.astype(o_ref.dtype)


def interactiveness_head(q, w1, b1, w2, b2, *, max_rows_per_tile=1024):
    """q: (B, N, dim) -> logits (B, N), matching PyTorch `self.mlp(q).squeeze(-1)`.

    Weights are stored pre-transposed: w1 (dim, hidden), w2 (hidden, 1).
    """
    B, N, dim = q.shape
    hidden = w1.shape[1]
    M = B * N
    q2d = q.reshape(M, dim)

    # Sublane alignment for the row tile: 8 for 4-byte dtypes, 16 for 2-byte.
    row_align = 16 if q2d.dtype.itemsize == 2 else 8

    # Pick the row tile: large enough for good HBM roofline utilization, small
    # enough that 2 double-buffered q tiles + resident weights stay comfortably
    # inside default scoped VMEM on every generation (incl. v7x's 64 MiB).
    bytes_per_row = dim * q2d.dtype.itemsize
    vmem_rows = max(row_align, (2 * 1024 * 1024) // max(bytes_per_row, 1))
    tm = min(max_rows_per_tile, vmem_rows, _round_up(M, row_align))
    tm = max(row_align, (tm // row_align) * row_align)

    # Pad rows so every grid tile is full (no ragged masked tail tile).
    Mp = _round_up(M, tm)
    if Mp != M:
        q2d = jnp.pad(q2d, ((0, Mp - M), (0, 0)))

    # First-layer weight in the streaming dtype; tiny second stage stays f32.
    w1c = w1.astype(q2d.dtype)
    b1_2d = b1.reshape(1, hidden).astype(jnp.float32)
    w2t = w2.reshape(1, hidden).astype(jnp.float32)   # pre-transposed Linear-2 weight
    b2_2d = b2.reshape(1, 1).astype(jnp.float32)

    grid = (Mp // tm,)

    cost = pl.CostEstimate(
        flops=2 * Mp * dim * hidden + 3 * Mp * hidden,
        transcendentals=0,
        bytes_accessed=(
            Mp * dim * q2d.dtype.itemsize        # streamed q
            + dim * hidden * w1c.dtype.itemsize  # w1 (read once, resident)
            + Mp * 4                             # f32 output
        ),
    )

    out = pl.pallas_call(
        _interactiveness_kernel,
        out_shape=jax.ShapeDtypeStruct((Mp, 1), jnp.float32),
        grid=grid,
        in_specs=[
            pl.BlockSpec((tm, dim), lambda i: (i, 0)),          # streamed q rows
            pl.BlockSpec((dim, hidden), lambda i: (0, 0)),      # resident w1
            pl.BlockSpec((1, hidden), lambda i: (0, 0)),        # resident b1
            pl.BlockSpec((1, hidden), lambda i: (0, 0)),        # resident w2^T
            pl.BlockSpec(memory_space=pltpu.MemorySpace.SMEM),  # scalar b2
        ],
        out_specs=pl.BlockSpec((tm, 1), lambda i: (i, 0)),
        compiler_params=pltpu.CompilerParams(
            dimension_semantics=("parallel",),  # disjoint output blocks -> megacore/v7x TC sharding
        ),
        cost_estimate=cost,
    )(q2d, w1c, b1_2d, w2t, b2_2d)

    return out[:M, 0].reshape(B, N)


def init_params(key, dim):
    """Deterministic init matching reset_parameters():
    xavier_uniform_ on weights, bias=0.0, last bias=-1.5."""
    hidden = dim // 2
    k1, k2 = jax.random.split(key)

    # xavier_uniform: U(-a, a), a = sqrt(6 / (fan_in + fan_out))
    a1 = math.sqrt(6.0 / (dim + hidden))
    a2 = math.sqrt(6.0 / (hidden + 1))

    # Stored as (in_features, out_features) == transposed PyTorch layout.
    w1 = jax.random.uniform(k1, (dim, hidden), jnp.float32, -a1, a1)
    b1 = jnp.zeros((hidden,), jnp.float32)
    w2 = jax.random.uniform(k2, (hidden, 1), jnp.float32, -a2, a2)
    b2 = jnp.full((1,), -1.5, jnp.float32)
    return w1, b1, w2, b2


if __name__ == "__main__":
    dim = 32
    B, N = 2, 8  # batch of 2, 8 pair queries each

    key = jax.random.PRNGKey(0)
    k_q, k_p = jax.random.split(key)

    q = jax.random.normal(k_q, (B, N, dim), jnp.float32)
    w1, b1, w2, b2 = init_params(k_p, dim)

    out = interactiveness_head(q, w1, b1, w2, b2)
    out = jax.block_until_ready(out)

    # Pure-JAX reference to sanity check the kernel.
    h_ref = jnp.maximum(q.reshape(-1, dim) @ w1 + b1, 0.0)
    ref = (h_ref @ w2 + b2).reshape(B, N)
    assert out.shape == (B, N)
    assert jnp.allclose(out, ref, atol=1e-5, rtol=1e-5)

    print("KERNEL_OK")
</pallas_src>

<mosaic_0001>
module attributes {stable_mosaic.version = 11 : i64} {
  func.func @_interactiveness_kernel(%arg0: i32, %arg1: memref<16x32xf32, #tpu.memory_space<vmem>>, %arg2: memref<32x16xf32, #tpu.memory_space<vmem>>, %arg3: memref<1x16xf32, #tpu.memory_space<vmem>>, %arg4: memref<1x16xf32, #tpu.memory_space<vmem>>, %arg5: memref<1x1xf32, #tpu.memory_space<smem>>, %arg6: memref<16x1xf32, #tpu.memory_space<vmem>>) attributes {dimension_semantics = [#tpu.dimension_semantics<parallel>], iteration_bounds = array<i64: 1>, scalar_prefetch = 0 : i64, scratch_operands = 0 : i64, tpu.core_type = #tpu.core_type<tc>, window_params = [{transform_indices = @transform_0, window_bounds = array<i64: 16, 32>}, {pipeline_mode = #tpu.pipeline_mode<synchronous>, transform_indices = @transform_1, window_bounds = array<i64: 32, 16>}, {pipeline_mode = #tpu.pipeline_mode<synchronous>, transform_indices = @transform_2, window_bounds = array<i64: 1, 16>}, {pipeline_mode = #tpu.pipeline_mode<synchronous>, transform_indices = @transform_3, window_bounds = array<i64: 1, 16>}, {transform_indices = @transform_4, window_bounds = array<i64: 1, 1>}, {transform_indices = @transform_5, window_bounds = array<i64: 16, 1>}]} {
    %c0 = arith.constant 0 : index
    %c0_0 = arith.constant 0 : index
    %0 = vector.load %arg1[%c0, %c0_0] : memref<16x32xf32, #tpu.memory_space<vmem>>, vector<16x32xf32>
    %c0_1 = arith.constant 0 : index
    %c0_2 = arith.constant 0 : index
    %1 = vector.load %arg2[%c0_1, %c0_2] : memref<32x16xf32, #tpu.memory_space<vmem>>, vector<32x16xf32>
    %cst = arith.constant dense<0.000000e+00> : vector<16x16xf32>
    %2 = tpu.matmul %0, %1, %cst {dimension_numbers = #tpu.dot_dimension_numbers<[1], [0], [0], [1], [0, 0, 1, 1], [], []>} : vector<16x32xf32>, vector<32x16xf32>, vector<16x16xf32> -> vector<16x16xf32>
    %c0_3 = arith.constant 0 : index
    %c0_4 = arith.constant 0 : index
    %3 = vector.load %arg3[%c0_3, %c0_4] : memref<1x16xf32, #tpu.memory_space<vmem>>, vector<1x16xf32>
    %4 = vector.broadcast %3 : vector<1x16xf32> to vector<16x16xf32>
    %5 = arith.addf %2, %4 : vector<16x16xf32>
    %cst_5 = arith.constant 0.000000e+00 : f32
    %6 = vector.broadcast %cst_5 : f32 to vector<16x16xf32>
    %7 = arith.maximumf %5, %6 : vector<16x16xf32>
    %c0_6 = arith.constant 0 : index
    %c0_7 = arith.constant 0 : index
    %8 = vector.load %arg4[%c0_6, %c0_7] : memref<1x16xf32, #tpu.memory_space<vmem>>, vector<1x16xf32>
    %9 = vector.broadcast %8 : vector<1x16xf32> to vector<16x16xf32>
    %10 = arith.mulf %7, %9 : vector<16x16xf32>
    %cst_8 = arith.constant dense<0.000000e+00> : vector<16xf32>
    %11 = vector.multi_reduction <add>, %10, %cst_8 [1] : vector<16x16xf32> to vector<16xf32>
    %12 = vector.shape_cast %11 : vector<16xf32> to vector<16x1xf32>
    %c0_9 = arith.constant 0 : index
    %c0_10 = arith.constant 0 : index
    %13 = memref.load %arg5[%c0_9, %c0_10] : memref<1x1xf32, #tpu.memory_space<smem>>
    %14 = vector.broadcast %13 : f32 to vector<16x1xf32>
    %15 = arith.addf %12, %14 : vector<16x1xf32>
    %c0_11 = arith.constant 0 : index
    %c0_12 = arith.constant 0 : index
    %16 = vector.load %arg6[%c0_11, %c0_12] : memref<16x1xf32, #tpu.memory_space<vmem>>, vector<16x1xf32>
    tpu.vector_store %arg6[%c0_11, %c0_12], %15 {strides = array<i32>} : memref<16x1xf32, #tpu.memory_space<vmem>>, vector<16x1xf32>,
    return
  }
  func.func @transform_0(%arg0: i32) -> (i32, i32) {
    %c0_i32 = arith.constant 0 : i32
    %c0_i32_0 = arith.constant 0 : i32
    return %arg0, %c0_i32 : i32, i32
  }
  func.func @transform_1(%arg0: i32) -> (i32, i32) {
    %c0_i32 = arith.constant 0 : i32
    %c0_i32_0 = arith.constant 0 : i32
    %c0_i32_1 = arith.constant 0 : i32
    return %c0_i32, %c0_i32_0 : i32, i32
  }
  func.func @transform_2(%arg0: i32) -> (i32, i32) {
    %c0_i32 = arith.constant 0 : i32
    %c0_i32_0 = arith.constant 0 : i32
    %c0_i32_1 = arith.constant 0 : i32
    return %c0_i32, %c0_i32_0 : i32, i32
  }
  func.func @transform_3(%arg0: i32) -> (i32, i32) {
    %c0_i32 = arith.constant 0 : i32
    %c0_i32_0 = arith.constant 0 : i32
    %c0_i32_1 = arith.constant 0 : i32
    return %c0_i32, %c0_i32_0 : i32, i32
  }
  func.func @transform_4(%arg0: i32) -> (i32, i32) {
    %c0_i32 = arith.constant 0 : i32
    %c0_i32_0 = arith.constant 0 : i32
    %c0_i32_1 = arith.constant 0 : i32
    return %c0_i32, %c0_i32_0 : i32, i32
  }
  func.func @transform_5(%arg0: i32) -> (i32, i32) {
    %c0_i32 = arith.constant 0 : i32
    %c0_i32_0 = arith.constant 0 : i32
    return %arg0, %c0_i32 : i32, i32
  }
}

</mosaic_0001>

<bundles_post_ra>
// kernel: tpu_custom_call.1
= control target key start
LH: loop header
LB: loop body
LE: loop exit
PB: predicated region body
PF: predicated region fallthrough
CT: control target
= control target key end

     0   :  { %vm34_vm0 = vcmask 261120   ;;  %vm127_vm1 = vcmask 130048   ;;  %vm138_vm2 = vcmask 7168   ;;  %s237_s1 = inlined_call_operand.vmem [shape: f32[32,16], index: 1, kind: input, shape index: {}]   ;;  %s238_s0 = inlined_call_operand.vmem [shape: f32[16,32], index: 0, kind: input, shape index: {}]   ;;  %s239_s2 = inlined_call_operand.vmem [shape: f32[1,16], index: 2, kind: input, shape index: {}]   ;;  %s240_s3 = inlined_call_operand.vmem [shape: f32[1,16], index: 3, kind: input, shape index: {}]   ;;  %s241_s4 = inlined_call_operand.<no memory space> [shape: f32[1,1], index: 4, kind: input, shape index: {}]   ;;  %s242_s5 = inlined_call_operand.vmem [shape: f32[16,1], index: 5, kind: output, shape index: {}]  }
   0x1   :  { %v23_v0 = vld [vmem:[%s237_s1] sm:$0xff]  ;;  %v24_v1 = vld [vmem:[%s237_s1 + $0x8] sm:$0xff]  ;;  %v25_v2 = vld [vmem:[%s237_s1 + $0x10] sm:$0xff]  ;;  %v135_v20 = vstv %s241_s4 }
   0x2   :  { %v166_v3 = vpack.c.bf16 %v24_v1, %v23_v0  ;;  %v26_v4 = vld [vmem:[%s237_s1 + $0x18] sm:$0xff]  ;;  %v21_v5 = vld [vmem:[%s238_s0] sm:$0xff]  ;;  %v22_v7 = vld [vmem:[%s238_s0 + $0x8] sm:$0xff] }
   0x3   :  { %v170_v6 = vpack.c.bf16 %v26_v4, %v25_v2  ;;  %163 = vmatprep.mubr.msk.f32.mxu0 %vm34_vm0, %v21_v5  ;;  %v145_v8 = vld [vmem:[%s239_s2] ss:$0 sm:$0xff] }
   0x4   :  { %167 = vmatprep.subr.bf16.mxu0 %v166_v3  ;;  %v148_v13 = vld [vmem:[%s240_s3] ss:$0 sm:$0xff] }
   0x5   :  { %169 = vmatpush3.bf16.msra.mxu0 %v166_v3 }
   0x6   :  { %171 = vmatprep.subr.bf16.mxu0 %v170_v6 }
   0x9   :  { %173 = vmatpush3.bf16.msra.mxu0 %v170_v6 }
   0xc   :  { %164 = vmatmul.mubr.msk.f32.vlgmr.msra.gmra.mrb[0].mxu0 %vm34_vm0, %v22_v7 }
  0xdf   :  { %v165_v9 = vpop.f32.mrb[0].mxu0 }
  0xe0   :  { %v113_v10 = vadd.f32 %v165_v9, %v145_v8  ;;  %v107_v11 = vpop.f32.mrb[1].mxu0 }
  0xe1   :  { %v108_v12 = vadd.f32 %v145_v8, %v107_v11 }
  0xe2   :  { %v117_v14 = vmax.f32 %v113_v10, 0.0 }
  0xe3   :  { %v116_v15 = vmax.f32 %v108_v12, 0.0 }
  0xe4   :  { %v126_v18 = vmul.f32 %v148_v13, %v117_v14 }
  0xe5   :  { %v125_v16 = vmul.f32 %v148_v13, %v116_v15 }
  0xe6   :  { %v131_v19 = vsel %vm127_vm1, %v126_v18, 0.0 }
  0xe7   :  { %v128_v17 = vsel %vm127_vm1, %v125_v16, 0.0 }
  0xe8   :  { %129 = vadd.xlane.f32.xlu0 %v128_v17 }
  0xec   :  { %132 = vadd.xlane.f32.xlu0 %v131_v19 }
 0x175   :  { %v130_v21 = vpop.xlane.xlu0 %129 }
 0x176   :  { %v136_v22 = vadd.f32 %v135_v20, %v130_v21 }
 0x178   :  { %139 = vst.msk [vmem:[%s242_s5] sm:$0xff] %vm138_vm2, %v136_v22 }
 0x179   :  { %v133_v23 = vpop.xlane.xlu0 %132 }
 0x17a   :  { %v137_v24 = vadd.f32 %v135_v20, %v133_v23 }
 0x17c   :  { %140 = vst.msk [vmem:[%s242_s5 + $0x8] sm:$0xff] %vm138_vm2, %v137_v24 }

</bundles_post_ra>
